<compile_context>
chip_gen: v5e
topology: v5e:2x2
jax: 0.10.0
libtpu: 0.0.40
codegen_flags: <defaults>
</compile_context>

<pallas_src>
import functools

import jax
import jax.numpy as jnp
import numpy as np
from jax.experimental import pallas as pl
from jax.experimental.pallas import tpu as pltpu

EMB = 16          # embedding_size
NUM_LAYERS = 3    # static choice of the `num_layers` branch
N_NODES = 8
N_EDGES = 16
EDGE_DIM = 5


def _vmem_spec():
    return pl.BlockSpec(memory_space=pltpu.MemorySpace.VMEM)


def make_repeat_sum(in_ch, out_ch):
    """R [in, in*out] repeats each input channel out_ch times; S [in*out, out] block-sums."""
    R = np.zeros((in_ch, in_ch * out_ch), np.float32)
    S = np.zeros((in_ch * out_ch, out_ch), np.float32)
    eye = np.eye(out_ch, dtype=np.float32)
    for i in range(in_ch):
        R[i, i * out_ch:(i + 1) * out_ch] = 1.0
        S[i * out_ch:(i + 1) * out_ch, :] = eye
    return jnp.asarray(R), jnp.asarray(S)


# ----------------------------------------------------------------------------
# Fused Pallas kernel: whole model in one launch
# ----------------------------------------------------------------------------
def fused_model_kernel(x_ref, ea_ref, g_ref, a_ref,
                       # embed layer (NNConv 10 -> EMB): edge MLP, root, bias, R/S
                       ew1, eb1, ew2, eb2, eroot, ebias, eR, eS,
                       # shared main edge MLP (EMB -> EMB) + its R/S
                       mw1, mb1, mw2, mb2, mR, mS,
                       # hidden-layer root weights / biases, stacked [L, ...]
                       hroots, hbiases,
                       # end layer (NNConv EMB -> 10)
                       nw1, nb1, nw2, nb2, nroot, nbias, nR, nS,
                       # final Linear(10, 1)
                       ow, ob,
                       out_ref, *, num_layers):
    f32 = jnp.float32
    ea = ea_ref[...]          # [E, 5]
    g = g_ref[...]            # [E, N]  source one-hot gather
    a = a_ref[...]            # [N, E]  mean scatter (1/deg folded in)

    def edge_mlp(w1, b1, w2, b2):
        # Linear(5,10) -> ReLU -> Linear(10, in*out); computed once per distinct MLP.
        h1 = jnp.maximum(
            jnp.dot(ea, w1[...], preferred_element_type=f32) + b1[...], 0.0)
        return jnp.dot(h1, w2[...], preferred_element_type=f32) + b2[...]

    def nnconv(x, we, R, S, root, bias):
        # x: [N, in], we: [E, in*out] (row-major reshape of Theta_e)
        xs = jnp.dot(g, x, preferred_element_type=f32)              # [E, in]     gather
        xs_rep = jnp.dot(xs, R, preferred_element_type=f32)         # [E, in*out] repeat
        m = jnp.dot(xs_rep * we, S, preferred_element_type=f32)     # [E, out]    block-sum
        h = (jnp.dot(a, m, preferred_element_type=f32)              # mean aggregation
             + jnp.dot(x, root, preferred_element_type=f32) + bias)
        return jnp.maximum(h, 0.0)

    # Edge-conditioned weights — each edge MLP evaluated exactly once.
    we_embed = edge_mlp(ew1, eb1, ew2, eb2)     # [E, 10*EMB]
    we_main = edge_mlp(mw1, mb1, mw2, mb2)      # [E, EMB*EMB]  shared by all hidden layers
    we_end = edge_mlp(nw1, nb1, nw2, nb2)       # [E, EMB*10]

    # Hoist constant loads out of the statically-unrolled layer loop.
    mR_v, mS_v = mR[...], mS[...]

    # embed: NNConv(10 -> EMB), relu, dropout(identity)
    h = nnconv(x_ref[...], we_embed, eR[...], eS[...], eroot[...], ebias[...])
    # hidden layers: shared edge MLP, per-layer root weight / bias (static slices).
    for l in range(num_layers):
        h = nnconv(h, we_main, mR_v, mS_v, hroots[l], hbiases[l])
    # end: NNConv(EMB -> 10), relu
    h = nnconv(h, we_end, nR[...], nS[...], nroot[...], nbias[...])
    # out: Linear(10, 1)
    out_ref[...] = jnp.dot(h, ow[...], preferred_element_type=f32) + ob[...]


# ----------------------------------------------------------------------------
# Wrapper
# ----------------------------------------------------------------------------
def nnconv_model(num_layers, x, G, A, edge_attr, params):
    n = x.shape[0]
    eR, eS = make_repeat_sum(10, EMB)
    mR, mS = make_repeat_sum(EMB, EMB)
    nR, nS = make_repeat_sum(EMB, 10)

    hroots = jnp.stack([params["hidden"][l]["root"] for l in range(num_layers)])   # [L,EMB,EMB]
    hbiases = jnp.stack([params["hidden"][l]["bias"] for l in range(num_layers)])  # [L,1,EMB]

    pe, pm, pn = params["embed"], params["main_shared"], params["end"]
    args = (
        x, edge_attr, G, A,
        pe["w1"], pe["b1"], pe["w2"], pe["b2"], pe["root"], pe["bias"], eR, eS,
        pm["w1"], pm["b1"], pm["w2"], pm["b2"], mR, mS,
        hroots, hbiases,
        pn["w1"], pn["b1"], pn["w2"], pn["b2"], pn["root"], pn["bias"], nR, nS,
        params["out_w"], params["out_b"],
    )
    kernel = functools.partial(fused_model_kernel, num_layers=num_layers)
    return pl.pallas_call(
        kernel,
        out_shape=jax.ShapeDtypeStruct((n, 1), jnp.float32),
        in_specs=[_vmem_spec()] * len(args),
        out_specs=_vmem_spec(),
    )(*args)


# ----------------------------------------------------------------------------
# Parameter init (deterministic, PyTorch-Linear-style uniform bounds)
# ----------------------------------------------------------------------------
def init_linear(key, fan_in, fan_out):
    kw, kb = jax.random.split(key)
    bound = 1.0 / np.sqrt(fan_in)
    w = jax.random.uniform(kw, (fan_in, fan_out), jnp.float32, -bound, bound)
    b = jax.random.uniform(kb, (1, fan_out), jnp.float32, -bound, bound)
    return w, b


def init_edge_net(key, in_ch, out_ch):
    k1, k2 = jax.random.split(key)
    w1, b1 = init_linear(k1, EDGE_DIM, 10)
    w2, b2 = init_linear(k2, 10, in_ch * out_ch)
    return {"w1": w1, "b1": b1, "w2": w2, "b2": b2}


def init_nnconv(key, in_ch, out_ch, with_edge_net=True):
    ke, kr, kb = jax.random.split(key, 3)
    bound = 1.0 / np.sqrt(in_ch)
    p = {
        "root": jax.random.uniform(kr, (in_ch, out_ch), jnp.float32, -bound, bound),
        "bias": jax.random.uniform(kb, (1, out_ch), jnp.float32, -bound, bound),
    }
    if with_edge_net:
        p.update(init_edge_net(ke, in_ch, out_ch))
    return p


def init_params(key):
    keys = jax.random.split(key, 10)
    params = {
        "embed": init_nnconv(keys[0], 10, EMB),
        "main_shared": init_edge_net(keys[1], EMB, EMB),
        "hidden": [init_nnconv(keys[2 + l], EMB, EMB, with_edge_net=False)
                   for l in range(6)],
        "end": init_nnconv(keys[8], EMB, 10),
    }
    out_w, out_b = init_linear(keys[9], 10, 1)
    params["out_w"], params["out_b"] = out_w, out_b
    return params


# ----------------------------------------------------------------------------
# Pure-JAX reference (for correctness check)
# ----------------------------------------------------------------------------
def ref_nnconv(x, edge_attr, src, tgt, p, in_ch, out_ch, relu=True):
    h1 = jnp.maximum(edge_attr @ p["w1"] + p["b1"], 0.0)
    theta = (h1 @ p["w2"] + p["b2"]).reshape(-1, in_ch, out_ch)
    xs = x[src]
    m = jnp.einsum("ei,eio->eo", xs, theta)
    n = x.shape[0]
    summed = jnp.zeros((n, out_ch), jnp.float32).at[tgt].add(m)
    deg = jnp.zeros((n,), jnp.float32).at[tgt].add(1.0)
    aggr = summed * jnp.where(deg > 0, 1.0 / deg, 0.0)[:, None]
    h = aggr + x @ p["root"] + p["bias"]
    return jnp.maximum(h, 0.0) if relu else h


def ref_model(num_layers, x, src, tgt, edge_attr, params):
    h = ref_nnconv(x, edge_attr, src, tgt, params["embed"], 10, EMB)
    for l in range(num_layers):
        p = dict(params["main_shared"])
        p.update(params["hidden"][l])
        h = ref_nnconv(h, edge_attr, src, tgt, p, EMB, EMB)
    h = ref_nnconv(h, edge_attr, src, tgt, params["end"], EMB, 10)
    return h @ params["out_w"] + params["out_b"]


# ----------------------------------------------------------------------------
# Main
# ----------------------------------------------------------------------------
if __name__ == "__main__":
    key = jax.random.PRNGKey(0)
    kx, ke, ks, kt, kp = jax.random.split(key, 5)

    x = jax.random.normal(kx, (N_NODES, 10), jnp.float32)
    edge_attr = jax.random.normal(ke, (N_EDGES, EDGE_DIM), jnp.float32)
    src = jax.random.randint(ks, (N_EDGES,), 0, N_NODES)
    tgt = jax.random.randint(kt, (N_EDGES,), 0, N_NODES)
    edge_index = jnp.stack([src, tgt], axis=0)  # [2, E], PyG convention

    # Dense gather / mean-scatter operators (host-side glue; compute runs in the kernel).
    G = jax.nn.one_hot(src, N_NODES, dtype=jnp.float32)                       # [E, N]
    deg = jnp.zeros((N_NODES,), jnp.float32).at[tgt].add(1.0)
    inv_deg = jnp.where(deg > 0, 1.0 / deg, 0.0)
    A = jax.nn.one_hot(tgt, N_NODES, dtype=jnp.float32).T * inv_deg[:, None]  # [N, E]

    params = init_params(kp)

    out = nnconv_model(NUM_LAYERS, x, G, A, edge_attr, params)
    out = jax.block_until_ready(out)

    ref = ref_model(NUM_LAYERS, x, src, tgt, edge_attr, params)
    np.testing.assert_allclose(np.asarray(out), np.asarray(ref), rtol=1e-4, atol=1e-4)

    assert out.shape == (N_NODES, 1)
    print("KERNEL_OK")
</pallas_src>

<mosaic_0001>
module attributes {stable_mosaic.version = 11 : i64} {
  func.func @fused_model_kernel(%arg0: memref<8x10xf32, #tpu.memory_space<vmem>>, %arg1: memref<16x5xf32, #tpu.memory_space<vmem>>, %arg2: memref<16x8xf32, #tpu.memory_space<vmem>>, %arg3: memref<8x16xf32, #tpu.memory_space<vmem>>, %arg4: memref<5x10xf32, #tpu.memory_space<vmem>>, %arg5: memref<1x10xf32, #tpu.memory_space<vmem>>, %arg6: memref<10x160xf32, #tpu.memory_space<vmem>>, %arg7: memref<1x160xf32, #tpu.memory_space<vmem>>, %arg8: memref<10x16xf32, #tpu.memory_space<vmem>>, %arg9: memref<1x16xf32, #tpu.memory_space<vmem>>, %arg10: memref<10x160xf32, #tpu.memory_space<vmem>>, %arg11: memref<160x16xf32, #tpu.memory_space<vmem>>, %arg12: memref<5x10xf32, #tpu.memory_space<vmem>>, %arg13: memref<1x10xf32, #tpu.memory_space<vmem>>, %arg14: memref<10x256xf32, #tpu.memory_space<vmem>>, %arg15: memref<1x256xf32, #tpu.memory_space<vmem>>, %arg16: memref<16x256xf32, #tpu.memory_space<vmem>>, %arg17: memref<256x16xf32, #tpu.memory_space<vmem>>, %arg18: memref<3x16x16xf32, #tpu.memory_space<vmem>>, %arg19: memref<3x1x16xf32, #tpu.memory_space<vmem>>, %arg20: memref<5x10xf32, #tpu.memory_space<vmem>>, %arg21: memref<1x10xf32, #tpu.memory_space<vmem>>, %arg22: memref<10x160xf32, #tpu.memory_space<vmem>>, %arg23: memref<1x160xf32, #tpu.memory_space<vmem>>, %arg24: memref<16x10xf32, #tpu.memory_space<vmem>>, %arg25: memref<1x10xf32, #tpu.memory_space<vmem>>, %arg26: memref<16x160xf32, #tpu.memory_space<vmem>>, %arg27: memref<160x10xf32, #tpu.memory_space<vmem>>, %arg28: memref<10x1xf32, #tpu.memory_space<vmem>>, %arg29: memref<1x1xf32, #tpu.memory_space<vmem>>, %arg30: memref<8x1xf32, #tpu.memory_space<vmem>>) attributes {dimension_semantics = [], scalar_prefetch = 0 : i64, scratch_operands = 0 : i64, tpu.core_type = #tpu.core_type<tc>} {
    %c0 = arith.constant 0 : index
    %c0_0 = arith.constant 0 : index
    %0 = vector.load %arg1[%c0, %c0_0] : memref<16x5xf32, #tpu.memory_space<vmem>>, vector<16x5xf32>
    %c0_1 = arith.constant 0 : index
    %c0_2 = arith.constant 0 : index
    %1 = vector.load %arg2[%c0_1, %c0_2] : memref<16x8xf32, #tpu.memory_space<vmem>>, vector<16x8xf32>
    %c0_3 = arith.constant 0 : index
    %c0_4 = arith.constant 0 : index
    %2 = vector.load %arg3[%c0_3, %c0_4] : memref<8x16xf32, #tpu.memory_space<vmem>>, vector<8x16xf32>
    %c0_5 = arith.constant 0 : index
    %c0_6 = arith.constant 0 : index
    %3 = vector.load %arg4[%c0_5, %c0_6] : memref<5x10xf32, #tpu.memory_space<vmem>>, vector<5x10xf32>
    %cst = arith.constant dense<0.000000e+00> : vector<16x10xf32>
    %4 = tpu.matmul %0, %3, %cst {dimension_numbers = #tpu.dot_dimension_numbers<[1], [0], [0], [1], [0, 0, 1, 1], [], []>} : vector<16x5xf32>, vector<5x10xf32>, vector<16x10xf32> -> vector<16x10xf32>
    %c0_7 = arith.constant 0 : index
    %c0_8 = arith.constant 0 : index
    %5 = vector.load %arg5[%c0_7, %c0_8] : memref<1x10xf32, #tpu.memory_space<vmem>>, vector<1x10xf32>
    %6 = vector.broadcast %5 : vector<1x10xf32> to vector<16x10xf32>
    %7 = arith.addf %4, %6 : vector<16x10xf32>
    %cst_9 = arith.constant 0.000000e+00 : f32
    %8 = vector.broadcast %cst_9 : f32 to vector<16x10xf32>
    %9 = arith.maximumf %7, %8 : vector<16x10xf32>
    %c0_10 = arith.constant 0 : index
    %c0_11 = arith.constant 0 : index
    %10 = vector.load %arg6[%c0_10, %c0_11] : memref<10x160xf32, #tpu.memory_space<vmem>>, vector<10x160xf32>
    %cst_12 = arith.constant dense<0.000000e+00> : vector<16x160xf32>
    %11 = tpu.matmul %9, %10, %cst_12 {dimension_numbers = #tpu.dot_dimension_numbers<[1], [0], [0], [1], [0, 0, 1, 1], [], []>} : vector<16x10xf32>, vector<10x160xf32>, vector<16x160xf32> -> vector<16x160xf32>
    %c0_13 = arith.constant 0 : index
    %c0_14 = arith.constant 0 : index
    %12 = vector.load %arg7[%c0_13, %c0_14] : memref<1x160xf32, #tpu.memory_space<vmem>>, vector<1x160xf32>
    %13 = vector.broadcast %12 : vector<1x160xf32> to vector<16x160xf32>
    %14 = arith.addf %11, %13 : vector<16x160xf32>
    %c0_15 = arith.constant 0 : index
    %c0_16 = arith.constant 0 : index
    %15 = vector.load %arg12[%c0_15, %c0_16] : memref<5x10xf32, #tpu.memory_space<vmem>>, vector<5x10xf32>
    %cst_17 = arith.constant dense<0.000000e+00> : vector<16x10xf32>
    %16 = tpu.matmul %0, %15, %cst_17 {dimension_numbers = #tpu.dot_dimension_numbers<[1], [0], [0], [1], [0, 0, 1, 1], [], []>} : vector<16x5xf32>, vector<5x10xf32>, vector<16x10xf32> -> vector<16x10xf32>
    %c0_18 = arith.constant 0 : index
    %c0_19 = arith.constant 0 : index
    %17 = vector.load %arg13[%c0_18, %c0_19] : memref<1x10xf32, #tpu.memory_space<vmem>>, vector<1x10xf32>
    %18 = vector.broadcast %17 : vector<1x10xf32> to vector<16x10xf32>
    %19 = arith.addf %16, %18 : vector<16x10xf32>
    %cst_20 = arith.constant 0.000000e+00 : f32
    %20 = vector.broadcast %cst_20 : f32 to vector<16x10xf32>
    %21 = arith.maximumf %19, %20 : vector<16x10xf32>
    %c0_21 = arith.constant 0 : index
    %c0_22 = arith.constant 0 : index
    %22 = vector.load %arg14[%c0_21, %c0_22] : memref<10x256xf32, #tpu.memory_space<vmem>>, vector<10x256xf32>
    %cst_23 = arith.constant dense<0.000000e+00> : vector<16x256xf32>
    %23 = tpu.matmul %21, %22, %cst_23 {dimension_numbers = #tpu.dot_dimension_numbers<[1], [0], [0], [1], [0, 0, 1, 1], [], []>} : vector<16x10xf32>, vector<10x256xf32>, vector<16x256xf32> -> vector<16x256xf32>
    %c0_24 = arith.constant 0 : index
    %c0_25 = arith.constant 0 : index
    %24 = vector.load %arg15[%c0_24, %c0_25] : memref<1x256xf32, #tpu.memory_space<vmem>>, vector<1x256xf32>
    %25 = vector.broadcast %24 : vector<1x256xf32> to vector<16x256xf32>
    %26 = arith.addf %23, %25 : vector<16x256xf32>
    %c0_26 = arith.constant 0 : index
    %c0_27 = arith.constant 0 : index
    %27 = vector.load %arg20[%c0_26, %c0_27] : memref<5x10xf32, #tpu.memory_space<vmem>>, vector<5x10xf32>
    %cst_28 = arith.constant dense<0.000000e+00> : vector<16x10xf32>
    %28 = tpu.matmul %0, %27, %cst_28 {dimension_numbers = #tpu.dot_dimension_numbers<[1], [0], [0], [1], [0, 0, 1, 1], [], []>} : vector<16x5xf32>, vector<5x10xf32>, vector<16x10xf32> -> vector<16x10xf32>
    %c0_29 = arith.constant 0 : index
    %c0_30 = arith.constant 0 : index
    %29 = vector.load %arg21[%c0_29, %c0_30] : memref<1x10xf32, #tpu.memory_space<vmem>>, vector<1x10xf32>
    %30 = vector.broadcast %29 : vector<1x10xf32> to vector<16x10xf32>
    %31 = arith.addf %28, %30 : vector<16x10xf32>
    %cst_31 = arith.constant 0.000000e+00 : f32
    %32 = vector.broadcast %cst_31 : f32 to vector<16x10xf32>
    %33 = arith.maximumf %31, %32 : vector<16x10xf32>
    %c0_32 = arith.constant 0 : index
    %c0_33 = arith.constant 0 : index
    %34 = vector.load %arg22[%c0_32, %c0_33] : memref<10x160xf32, #tpu.memory_space<vmem>>, vector<10x160xf32>
    %cst_34 = arith.constant dense<0.000000e+00> : vector<16x160xf32>
    %35 = tpu.matmul %33, %34, %cst_34 {dimension_numbers = #tpu.dot_dimension_numbers<[1], [0], [0], [1], [0, 0, 1, 1], [], []>} : vector<16x10xf32>, vector<10x160xf32>, vector<16x160xf32> -> vector<16x160xf32>
    %c0_35 = arith.constant 0 : index
    %c0_36 = arith.constant 0 : index
    %36 = vector.load %arg23[%c0_35, %c0_36] : memref<1x160xf32, #tpu.memory_space<vmem>>, vector<1x160xf32>
    %37 = vector.broadcast %36 : vector<1x160xf32> to vector<16x160xf32>
    %38 = arith.addf %35, %37 : vector<16x160xf32>
    %c0_37 = arith.constant 0 : index
    %c0_38 = arith.constant 0 : index
    %39 = vector.load %arg16[%c0_37, %c0_38] : memref<16x256xf32, #tpu.memory_space<vmem>>, vector<16x256xf32>
    %c0_39 = arith.constant 0 : index
    %c0_40 = arith.constant 0 : index
    %40 = vector.load %arg17[%c0_39, %c0_40] : memref<256x16xf32, #tpu.memory_space<vmem>>, vector<256x16xf32>
    %c0_41 = arith.constant 0 : index
    %c0_42 = arith.constant 0 : index
    %41 = vector.load %arg0[%c0_41, %c0_42] : memref<8x10xf32, #tpu.memory_space<vmem>>, vector<8x10xf32>
    %c0_43 = arith.constant 0 : index
    %c0_44 = arith.constant 0 : index
    %42 = vector.load %arg10[%c0_43, %c0_44] : memref<10x160xf32, #tpu.memory_space<vmem>>, vector<10x160xf32>
    %c0_45 = arith.constant 0 : index
    %c0_46 = arith.constant 0 : index
    %43 = vector.load %arg11[%c0_45, %c0_46] : memref<160x16xf32, #tpu.memory_space<vmem>>, vector<160x16xf32>
    %c0_47 = arith.constant 0 : index
    %c0_48 = arith.constant 0 : index
    %44 = vector.load %arg8[%c0_47, %c0_48] : memref<10x16xf32, #tpu.memory_space<vmem>>, vector<10x16xf32>
    %c0_49 = arith.constant 0 : index
    %c0_50 = arith.constant 0 : index
    %45 = vector.load %arg9[%c0_49, %c0_50] : memref<1x16xf32, #tpu.memory_space<vmem>>, vector<1x16xf32>
    %cst_51 = arith.constant dense<0.000000e+00> : vector<16x10xf32>
    %46 = tpu.matmul %1, %41, %cst_51 {dimension_numbers = #tpu.dot_dimension_numbers<[1], [0], [0], [1], [0, 0, 1, 1], [], []>} : vector<16x8xf32>, vector<8x10xf32>, vector<16x10xf32> -> vector<16x10xf32>
    %cst_52 = arith.constant dense<0.000000e+00> : vector<16x160xf32>
    %47 = tpu.matmul %46, %42, %cst_52 {dimension_numbers = #tpu.dot_dimension_numbers<[1], [0], [0], [1], [0, 0, 1, 1], [], []>} : vector<16x10xf32>, vector<10x160xf32>, vector<16x160xf32> -> vector<16x160xf32>
    %48 = arith.mulf %47, %14 : vector<16x160xf32>
    %cst_53 = arith.constant dense<0.000000e+00> : vector<16x16xf32>
    %49 = tpu.matmul %48, %43, %cst_53 {dimension_numbers = #tpu.dot_dimension_numbers<[1], [0], [0], [1], [0, 0, 1, 1], [], []>} : vector<16x160xf32>, vector<160x16xf32>, vector<16x16xf32> -> vector<16x16xf32>
    %cst_54 = arith.constant dense<0.000000e+00> : vector<8x16xf32>
    %50 = tpu.matmul %2, %49, %cst_54 {dimension_numbers = #tpu.dot_dimension_numbers<[1], [0], [0], [1], [0, 0, 1, 1], [], []>} : vector<8x16xf32>, vector<16x16xf32>, vector<8x16xf32> -> vector<8x16xf32>
    %cst_55 = arith.constant dense<0.000000e+00> : vector<8x16xf32>
    %51 = tpu.matmul %41, %44, %cst_55 {dimension_numbers = #tpu.dot_dimension_numbers<[1], [0], [0], [1], [0, 0, 1, 1], [], []>} : vector<8x10xf32>, vector<10x16xf32>, vector<8x16xf32> -> vector<8x16xf32>
    %52 = arith.addf %50, %51 : vector<8x16xf32>
    %53 = vector.broadcast %45 : vector<1x16xf32> to vector<8x16xf32>
    %54 = arith.addf %52, %53 : vector<8x16xf32>
    %cst_56 = arith.constant 0.000000e+00 : f32
    %55 = vector.broadcast %cst_56 : f32 to vector<8x16xf32>
    %56 = arith.maximumf %54, %55 : vector<8x16xf32>
    %c0_57 = arith.constant 0 : index
    %c0_58 = arith.constant 0 : index
    %c0_59 = arith.constant 0 : index
    %57 = vector.load %arg18[%c0_57, %c0_58, %c0_59] : memref<3x16x16xf32, #tpu.memory_space<vmem>>, vector<1x16x16xf32>
    %58 = vector.shape_cast %57 : vector<1x16x16xf32> to vector<16x16xf32>
    %c0_60 = arith.constant 0 : index
    %c0_61 = arith.constant 0 : index
    %c0_62 = arith.constant 0 : index
    %59 = vector.load %arg19[%c0_60, %c0_61, %c0_62] : memref<3x1x16xf32, #tpu.memory_space<vmem>>, vector<1x1x16xf32>
    %60 = vector.shape_cast %59 : vector<1x1x16xf32> to vector<1x16xf32>
    %cst_63 = arith.constant dense<0.000000e+00> : vector<16x16xf32>
    %61 = tpu.matmul %1, %56, %cst_63 {dimension_numbers = #tpu.dot_dimension_numbers<[1], [0], [0], [1], [0, 0, 1, 1], [], []>} : vector<16x8xf32>, vector<8x16xf32>, vector<16x16xf32> -> vector<16x16xf32>
    %cst_64 = arith.constant dense<0.000000e+00> : vector<16x256xf32>
    %62 = tpu.matmul %61, %39, %cst_64 {dimension_numbers = #tpu.dot_dimension_numbers<[1], [0], [0], [1], [0, 0, 1, 1], [], []>} : vector<16x16xf32>, vector<16x256xf32>, vector<16x256xf32> -> vector<16x256xf32>
    %63 = arith.mulf %62, %26 : vector<16x256xf32>
    %cst_65 = arith.constant dense<0.000000e+00> : vector<16x16xf32>
    %64 = tpu.matmul %63, %40, %cst_65 {dimension_numbers = #tpu.dot_dimension_numbers<[1], [0], [0], [1], [0, 0, 1, 1], [], []>} : vector<16x256xf32>, vector<256x16xf32>, vector<16x16xf32> -> vector<16x16xf32>
    %cst_66 = arith.constant dense<0.000000e+00> : vector<8x16xf32>
    %65 = tpu.matmul %2, %64, %cst_66 {dimension_numbers = #tpu.dot_dimension_numbers<[1], [0], [0], [1], [0, 0, 1, 1], [], []>} : vector<8x16xf32>, vector<16x16xf32>, vector<8x16xf32> -> vector<8x16xf32>
    %cst_67 = arith.constant dense<0.000000e+00> : vector<8x16xf32>
    %66 = tpu.matmul %56, %58, %cst_67 {dimension_numbers = #tpu.dot_dimension_numbers<[1], [0], [0], [1], [0, 0, 1, 1], [], []>} : vector<8x16xf32>, vector<16x16xf32>, vector<8x16xf32> -> vector<8x16xf32>
    %67 = arith.addf %65, %66 : vector<8x16xf32>
    %68 = vector.broadcast %60 : vector<1x16xf32> to vector<8x16xf32>
    %69 = arith.addf %67, %68 : vector<8x16xf32>
    %cst_68 = arith.constant 0.000000e+00 : f32
    %70 = vector.broadcast %cst_68 : f32 to vector<8x16xf32>
    %71 = arith.maximumf %69, %70 : vector<8x16xf32>
    %c1 = arith.constant 1 : index
    %c0_69 = arith.constant 0 : index
    %c0_70 = arith.constant 0 : index
    %72 = vector.load %arg18[%c1, %c0_69, %c0_70] : memref<3x16x16xf32, #tpu.memory_space<vmem>>, vector<1x16x16xf32>
    %73 = vector.shape_cast %72 : vector<1x16x16xf32> to vector<16x16xf32>
    %c1_71 = arith.constant 1 : index
    %c0_72 = arith.constant 0 : index
    %c0_73 = arith.constant 0 : index
    %74 = vector.load %arg19[%c1_71, %c0_72, %c0_73] : memref<3x1x16xf32, #tpu.memory_space<vmem>>, vector<1x1x16xf32>
    %75 = vector.shape_cast %74 : vector<1x1x16xf32> to vector<1x16xf32>
    %cst_74 = arith.constant dense<0.000000e+00> : vector<16x16xf32>
    %76 = tpu.matmul %1, %71, %cst_74 {dimension_numbers = #tpu.dot_dimension_numbers<[1], [0], [0], [1], [0, 0, 1, 1], [], []>} : vector<16x8xf32>, vector<8x16xf32>, vector<16x16xf32> -> vector<16x16xf32>
    %cst_75 = arith.constant dense<0.000000e+00> : vector<16x256xf32>
    %77 = tpu.matmul %76, %39, %cst_75 {dimension_numbers = #tpu.dot_dimension_numbers<[1], [0], [0], [1], [0, 0, 1, 1], [], []>} : vector<16x16xf32>, vector<16x256xf32>, vector<16x256xf32> -> vector<16x256xf32>
    %78 = arith.mulf %77, %26 : vector<16x256xf32>
    %cst_76 = arith.constant dense<0.000000e+00> : vector<16x16xf32>
    %79 = tpu.matmul %78, %40, %cst_76 {dimension_numbers = #tpu.dot_dimension_numbers<[1], [0], [0], [1], [0, 0, 1, 1], [], []>} : vector<16x256xf32>, vector<256x16xf32>, vector<16x16xf32> -> vector<16x16xf32>
    %cst_77 = arith.constant dense<0.000000e+00> : vector<8x16xf32>
    %80 = tpu.matmul %2, %79, %cst_77 {dimension_numbers = #tpu.dot_dimension_numbers<[1], [0], [0], [1], [0, 0, 1, 1], [], []>} : vector<8x16xf32>, vector<16x16xf32>, vector<8x16xf32> -> vector<8x16xf32>
    %cst_78 = arith.constant dense<0.000000e+00> : vector<8x16xf32>
    %81 = tpu.matmul %71, %73, %cst_78 {dimension_numbers = #tpu.dot_dimension_numbers<[1], [0], [0], [1], [0, 0, 1, 1], [], []>} : vector<8x16xf32>, vector<16x16xf32>, vector<8x16xf32> -> vector<8x16xf32>
    %82 = arith.addf %80, %81 : vector<8x16xf32>
    %83 = vector.broadcast %75 : vector<1x16xf32> to vector<8x16xf32>
    %84 = arith.addf %82, %83 : vector<8x16xf32>
    %cst_79 = arith.constant 0.000000e+00 : f32
    %85 = vector.broadcast %cst_79 : f32 to vector<8x16xf32>
    %86 = arith.maximumf %84, %85 : vector<8x16xf32>
    %c2 = arith.constant 2 : index
    %c0_80 = arith.constant 0 : index
    %c0_81 = arith.constant 0 : index
    %87 = vector.load %arg18[%c2, %c0_80, %c0_81] : memref<3x16x16xf32, #tpu.memory_space<vmem>>, vector<1x16x16xf32>
    %88 = vector.shape_cast %87 : vector<1x16x16xf32> to vector<16x16xf32>
    %c2_82 = arith.constant 2 : index
    %c0_83 = arith.constant 0 : index
    %c0_84 = arith.constant 0 : index
    %89 = vector.load %arg19[%c2_82, %c0_83, %c0_84] : memref<3x1x16xf32, #tpu.memory_space<vmem>>, vector<1x1x16xf32>
    %90 = vector.shape_cast %89 : vector<1x1x16xf32> to vector<1x16xf32>
    %cst_85 = arith.constant dense<0.000000e+00> : vector<16x16xf32>
    %91 = tpu.matmul %1, %86, %cst_85 {dimension_numbers = #tpu.dot_dimension_numbers<[1], [0], [0], [1], [0, 0, 1, 1], [], []>} : vector<16x8xf32>, vector<8x16xf32>, vector<16x16xf32> -> vector<16x16xf32>
    %cst_86 = arith.constant dense<0.000000e+00> : vector<16x256xf32>
    %92 = tpu.matmul %91, %39, %cst_86 {dimension_numbers = #tpu.dot_dimension_numbers<[1], [0], [0], [1], [0, 0, 1, 1], [], []>} : vector<16x16xf32>, vector<16x256xf32>, vector<16x256xf32> -> vector<16x256xf32>
    %93 = arith.mulf %92, %26 : vector<16x256xf32>
    %cst_87 = arith.constant dense<0.000000e+00> : vector<16x16xf32>
    %94 = tpu.matmul %93, %40, %cst_87 {dimension_numbers = #tpu.dot_dimension_numbers<[1], [0], [0], [1], [0, 0, 1, 1], [], []>} : vector<16x256xf32>, vector<256x16xf32>, vector<16x16xf32> -> vector<16x16xf32>
    %cst_88 = arith.constant dense<0.000000e+00> : vector<8x16xf32>
    %95 = tpu.matmul %2, %94, %cst_88 {dimension_numbers = #tpu.dot_dimension_numbers<[1], [0], [0], [1], [0, 0, 1, 1], [], []>} : vector<8x16xf32>, vector<16x16xf32>, vector<8x16xf32> -> vector<8x16xf32>
    %cst_89 = arith.constant dense<0.000000e+00> : vector<8x16xf32>
    %96 = tpu.matmul %86, %88, %cst_89 {dimension_numbers = #tpu.dot_dimension_numbers<[1], [0], [0], [1], [0, 0, 1, 1], [], []>} : vector<8x16xf32>, vector<16x16xf32>, vector<8x16xf32> -> vector<8x16xf32>
    %97 = arith.addf %95, %96 : vector<8x16xf32>
    %98 = vector.broadcast %90 : vector<1x16xf32> to vector<8x16xf32>
    %99 = arith.addf %97, %98 : vector<8x16xf32>
    %cst_90 = arith.constant 0.000000e+00 : f32
    %100 = vector.broadcast %cst_90 : f32 to vector<8x16xf32>
    %101 = arith.maximumf %99, %100 : vector<8x16xf32>
    %c0_91 = arith.constant 0 : index
    %c0_92 = arith.constant 0 : index
    %102 = vector.load %arg26[%c0_91, %c0_92] : memref<16x160xf32, #tpu.memory_space<vmem>>, vector<16x160xf32>
    %c0_93 = arith.constant 0 : index
    %c0_94 = arith.constant 0 : index
    %103 = vector.load %arg27[%c0_93, %c0_94] : memref<160x10xf32, #tpu.memory_space<vmem>>, vector<160x10xf32>
    %c0_95 = arith.constant 0 : index
    %c0_96 = arith.constant 0 : index
    %104 = vector.load %arg24[%c0_95, %c0_96] : memref<16x10xf32, #tpu.memory_space<vmem>>, vector<16x10xf32>
    %c0_97 = arith.constant 0 : index
    %c0_98 = arith.constant 0 : index
    %105 = vector.load %arg25[%c0_97, %c0_98] : memref<1x10xf32, #tpu.memory_space<vmem>>, vector<1x10xf32>
    %cst_99 = arith.constant dense<0.000000e+00> : vector<16x16xf32>
    %106 = tpu.matmul %1, %101, %cst_99 {dimension_numbers = #tpu.dot_dimension_numbers<[1], [0], [0], [1], [0, 0, 1, 1], [], []>} : vector<16x8xf32>, vector<8x16xf32>, vector<16x16xf32> -> vector<16x16xf32>
    %cst_100 = arith.constant dense<0.000000e+00> : vector<16x160xf32>
    %107 = tpu.matmul %106, %102, %cst_100 {dimension_numbers = #tpu.dot_dimension_numbers<[1], [0], [0], [1], [0, 0, 1, 1], [], []>} : vector<16x16xf32>, vector<16x160xf32>, vector<16x160xf32> -> vector<16x160xf32>
    %108 = arith.mulf %107, %38 : vector<16x160xf32>
    %cst_101 = arith.constant dense<0.000000e+00> : vector<16x10xf32>
    %109 = tpu.matmul %108, %103, %cst_101 {dimension_numbers = #tpu.dot_dimension_numbers<[1], [0], [0], [1], [0, 0, 1, 1], [], []>} : vector<16x160xf32>, vector<160x10xf32>, vector<16x10xf32> -> vector<16x10xf32>
    %cst_102 = arith.constant dense<0.000000e+00> : vector<8x10xf32>
    %110 = tpu.matmul %2, %109, %cst_102 {dimension_numbers = #tpu.dot_dimension_numbers<[1], [0], [0], [1], [0, 0, 1, 1], [], []>} : vector<8x16xf32>, vector<16x10xf32>, vector<8x10xf32> -> vector<8x10xf32>
    %cst_103 = arith.constant dense<0.000000e+00> : vector<8x10xf32>
    %111 = tpu.matmul %101, %104, %cst_103 {dimension_numbers = #tpu.dot_dimension_numbers<[1], [0], [0], [1], [0, 0, 1, 1], [], []>} : vector<8x16xf32>, vector<16x10xf32>, vector<8x10xf32> -> vector<8x10xf32>
    %112 = arith.addf %110, %111 : vector<8x10xf32>
    %113 = vector.broadcast %105 : vector<1x10xf32> to vector<8x10xf32>
    %114 = arith.addf %112, %113 : vector<8x10xf32>
    %cst_104 = arith.constant 0.000000e+00 : f32
    %115 = vector.broadcast %cst_104 : f32 to vector<8x10xf32>
    %116 = arith.maximumf %114, %115 : vector<8x10xf32>
    %c0_105 = arith.constant 0 : index
    %c0_106 = arith.constant 0 : index
    %117 = vector.load %arg28[%c0_105, %c0_106] : memref<10x1xf32, #tpu.memory_space<vmem>>, vector<10x1xf32>
    %cst_107 = arith.constant dense<0.000000e+00> : vector<8x1xf32>
    %118 = tpu.matmul %116, %117, %cst_107 {dimension_numbers = #tpu.dot_dimension_numbers<[1], [0], [0], [1], [0, 0, 1, 1], [], []>} : vector<8x10xf32>, vector<10x1xf32>, vector<8x1xf32> -> vector<8x1xf32>
    %c0_108 = arith.constant 0 : index
    %c0_109 = arith.constant 0 : index
    %119 = vector.load %arg29[%c0_108, %c0_109] : memref<1x1xf32, #tpu.memory_space<vmem>>, vector<1x1xf32>
    %120 = vector.broadcast %119 : vector<1x1xf32> to vector<8x1xf32>
    %121 = arith.addf %118, %120 : vector<8x1xf32>
    %c0_110 = arith.constant 0 : index
    %c0_111 = arith.constant 0 : index
    %122 = vector.load %arg30[%c0_110, %c0_111] : memref<8x1xf32, #tpu.memory_space<vmem>>, vector<8x1xf32>
    tpu.vector_store %arg30[%c0_110, %c0_111], %121 {strides = array<i32>} : memref<8x1xf32, #tpu.memory_space<vmem>>, vector<8x1xf32>,
    return
  }
}

</mosaic_0001>

<bundles_post_ra>
// kernel: tpu_custom_call.1
= control target key start
LH: loop header
LB: loop body
LE: loop exit
PB: predicated region body
PF: predicated region fallthrough
CT: control target
= control target key end

     0   :  { %s1638_s3 = smov 4   ;;  %s1639_s7 = smov 1   ;;  %vm145_vm0 = vcmask 1044480   ;;  %vm138_vm1 = vcmask 39936   ;;  %vm191_vm2 = vcmask 1041408   ;;  %vm184_vm3 = vcmask 80896   ;;  %s2179_s0 = inlined_call_operand.smem [shape: u32[31], index: -1, kind: input, shape index: {}] }
   0x1   :  { %s1489_s6 = sld [smem:[%s2179_s0 + %s1638_s3]]   ;;  %s1640_s11 = smov 5   ;;  %vm510_vm4 = vcmask 64512   ;;  %vm602_vm5 = vcmask 261120   ;;  %vm681_vm6 = vcmask 130048   ;;  %vm1480_vm7 = vcmask 7168  }
   0x2   :  { %s1486_s10 = sld [smem:[%s2179_s0 + %s1639_s7]]   ;;  %s1641_s15 = smov 6  }
   0x3   :  { %s1490_s14 = sld [smem:[%s2179_s0 + %s1640_s11]]   ;;  %s1642_s19 = smov 12  }
   0x4   :  { %s1491_s18 = sld [smem:[%s2179_s0 + %s1641_s15]]   ;;  %s1643_s23 = smov 13  }
   0x5   :  { %s1497_s22 = sld [smem:[%s2179_s0 + %s1642_s19]]   ;;  %s1644_s27 = smov 14  }
   0x6   :  { %s1498_s26 = sld [smem:[%s2179_s0 + %s1643_s23]]   ;;  %s1645_s1 = smov 20  }
   0x7   :  { %v133_v0 = vld [vmem:[%s1489_s6] sm:$0x1f]  ;;  %s1499_s30 = sld [smem:[%s2179_s0 + %s1644_s27]]   ;;  %s1646_s8 = smov 21  }
   0x8   :  { %1516 = vmatpush.msk.msra.mxu0 %vm145_vm0, %v133_v0  ;;  %v128_v1 = vld [vmem:[%s1486_s10] sm:$0xff]  ;;  %v129_v2 = vld [vmem:[%s1486_s10 + $0x8] sm:$0xff]  ;;  %s1505_s4 = sld [smem:[%s2179_s0 + %s1645_s1]]   ;;  %s1647_s12 = smov 2  }
   0x9   :  { %1517 = vmatmul.msk.f32.vlgmr.msra.gmra.mxu0 %vm138_vm1, %v128_v1  ;;  %v1629_v8 = vld [vmem:[%s1490_s14] ss:$0 sm:$0xff]  ;;  %s1_s7 = sld [smem:[%s2179_s0]]   ;;  %s1648_s16 = smov 22  }
   0xa   :  { %v176_v3 = vld [vmem:[%s1491_s18 + $0x10] sm:$0x3]  ;;  %v177_v4 = vld [vmem:[%s1491_s18 + $0x18] sm:$0x3]  ;;  %v174_v5 = vld [vmem:[%s1491_s18] sm:$0xff]  ;;  %s1506_s11 = sld [smem:[%s2179_s0 + %s1646_s8]]   ;;  %s1649_s20 = smov 10  }
   0xb   :  { %1519 = vmatpush.msk.msra.mxu1 %vm191_vm2, %v176_v3  ;;  %1522 = vmatpush.msk.msra.mxu2 %vm191_vm2, %v177_v4  ;;  %v175_v6 = vld [vmem:[%s1491_s18 + $0x8] sm:$0xff]  ;;  %v244_v7 = vld [vmem:[%s1497_s22] sm:$0x1f]  ;;  %s1487_s15 = sld [smem:[%s2179_s0 + %s1647_s12]]   ;;  %s1650_s24 = smov 11  }
   0xc   :  { %1598 = vmatpush.msk.msra.mxu3 %vm145_vm0, %v244_v7  ;;  %v1630_v23 = vld [vmem:[%s1498_s26] ss:$0 sm:$0xff]  ;;  %s1507_s19 = sld [smem:[%s2179_s0 + %s1648_s16]]   ;;  %s1651_s28 = smov 7  }
   0xd   :  { %213 = vmatpush.msra.mxu1 %v174_v5  ;;  %236 = vmatpush.msra.mxu2 %v175_v6  ;;  %v279_v15 = vld [vmem:[%s1499_s30 + $0x10] sm:$0x3]  ;;  %v280_v16 = vld [vmem:[%s1499_s30 + $0x18] sm:$0x3]  ;;  %v277_v17 = vld [vmem:[%s1499_s30] sm:$0xff]  ;;  %s1495_s23 = sld [smem:[%s2179_s0 + %s1649_s20]]   ;;  %s1652_s2 = smov 8  }
   0xe   :  { %1527 = vmatmul.msk.f32.vlgmr.msra.gmra.mxu3 %vm138_vm1, %v129_v2  ;;  %1528 = vmatpush.msk.msrb.mxu0 %vm191_vm2, %v279_v15  ;;  %v278_v18 = vld [vmem:[%s1499_s30 + $0x8] sm:$0xff]  ;;  %v345_v19 = vld [vmem:[%s1505_s4] sm:$0x1f]  ;;  %s1760_s27 = sld [smem:[%s2179_s0 + %s1650_s24]]   ;;  %s1653_s6 = smov 9  }
   0xf   :  { %1525 = vmatpush.msk.msrb.mxu1 %vm145_vm0, %v244_v7  ;;  %1531 = vmatpush.msk.msrb.mxu3 %vm191_vm2, %v280_v16  ;;  %v1717_v20 = vld [vmem:[%s1_s7] sm:$0xff]  ;;  %s1492_s1 = sld [smem:[%s2179_s0 + %s1651_s28]]   ;;  %s1654_s10 = smov 3  }
  0x10   :  { %314 = vmatpush.msrb.mxu0 %v277_v17  ;;  %v1631_v32 = vld [vmem:[%s1506_s11] ss:$0 sm:$0xff]  ;;  %s1493_s5 = sld [smem:[%s2179_s0 + %s1652_s2]]   ;;  %s1655_s14 = smov 18  }
  0x11   :  { %1518 = vmatmul.msk.f32.gmra.mxu0 %vm138_vm1, %v129_v2  ;;  %337 = vmatpush.msrb.mxu3 %v278_v18  ;;  %v1735_v30 = vld [vmem:[%s1487_s15] sm:$0xff]  ;;  %v1739_v31 = vld [vmem:[%s1487_s15 + $0x8] sm:$0xff]  ;;  %s1494_s9 = sld [smem:[%s2179_s0 + %s1653_s6]]   ;;  %s1656_s18 = smov 16  }
  0x12   :  { %v380_v33 = vld [vmem:[%s1507_s19 + $0x10] sm:$0x3]  ;;  %v381_v34 = vld [vmem:[%s1507_s19 + $0x18] sm:$0x3]  ;;  %v378_v38 = vld [vmem:[%s1507_s19] sm:$0xff]  ;;  %s1488_s13 = sld [smem:[%s2179_s0 + %s1654_s10]]   ;;  %s1657_s22 = smov 17  }
  0x13   :  { %532 = vmatpush.msra.mxu3 %v1717_v20  ;;  %1537 = vmatpush.msk.msrb.mxu2 %vm191_vm2, %v380_v33  ;;  %v379_v39 = vld [vmem:[%s1507_s19 + $0x8] sm:$0xff]  ;;  %v485_v43 = vld [vmem:[%s1495_s23 + $0x10] sm:$0x3]  ;;  %v486_v44 = vld [vmem:[%s1495_s23 + $0x18] sm:$0x3]  ;;  %s1828_s17 = sld [smem:[%s2179_s0 + %s1655_s14]]   ;;  %s1658_s26 = smov 15  }
  0x14   :  { %1540 = vmatpush.msk.msra.mxu0 %vm191_vm2, %v381_v34  ;;  %v483_v45 = vld [vmem:[%s1495_s23] sm:$0xff]  ;;  %v484_v46 = vld [vmem:[%s1495_s23 + $0x8] sm:$0xff]  ;;  %v502_v47 = vld [vmem:[%s1760_s27 + $0x78] sm:$0xff]  ;;  %s1501_s21 = sld [smem:[%s2179_s0 + %s1656_s18]]   ;;  %s1659_s30 = smov 19  }
  0x15   :  { %415 = vmatpush.msrb.mxu2 %v378_v38  ;;  %v501_v48 = vld [vmem:[%s1760_s27 + $0x70] sm:$0xff]  ;;  %v500_v49 = vld [vmem:[%s1760_s27 + $0x68] sm:$0xff]  ;;  %v499_v50 = vld [vmem:[%s1760_s27 + $0x60] sm:$0xff]  ;;  %s1855_s25 = sld [smem:[%s2179_s0 + %s1657_s22]]   ;;  %s1660_s4 = smov 26  }
  0x16   :  { %438 = vmatpush.msra.mxu0 %v379_v39  ;;  %v498_v51 = vld [vmem:[%s1760_s27 + $0x58] sm:$0xff]  ;;  %v497_v53 = vld [vmem:[%s1760_s27 + $0x50] sm:$0xff]  ;;  %v496_v57 = vld [vmem:[%s1760_s27 + $0x48] sm:$0xff]  ;;  %s1500_s29 = sld [smem:[%s2179_s0 + %s1658_s26]]   ;;  %s1661_s8 = smov 24  }
  0x17   :  { %v495_v58 = vld [vmem:[%s1760_s27 + $0x40] sm:$0xff]  ;;  %v494_v59 = vld [vmem:[%s1760_s27 + $0x38] sm:$0xff]  ;;  %v493_v60 = vld [vmem:[%s1760_s27 + $0x30] sm:$0xff]  ;;  %s2028_s3 = sld [smem:[%s2179_s0 + %s1659_s30]]   ;;  %s1662_s12 = smov 27  }
  0x18   :  { %v492_v61 = vld [vmem:[%s1760_s27 + $0x28] sm:$0xff]  ;;  %v491_v62 = vld [vmem:[%s1760_s27 + $0x20] sm:$0xff]  ;;  %v490_v63 = vld [vmem:[%s1760_s27 + $0x18] sm:$0xff]  ;;  %s1511_s7 = sld [smem:[%s2179_s0 + %s1660_s4]]   ;;  %s1663_s16 = smov 23  }
  0x19   :  { %v489_v0 = vld [vmem:[%s1760_s27 + $0x10] sm:$0xff]  ;;  %v487_v3 = vld [vmem:[%s1760_s27] sm:$0xff]  ;;  %v506_v4 = vld [vmem:[%s1760_s27 + $0x98] sm:$0xff]  ;;  %s1509_s11 = sld [smem:[%s2179_s0 + %s1661_s8]]   ;;  %s1664_s20 = smov 25  }
  0x1a   :  { %v505_v5 = vld [vmem:[%s1760_s27 + $0x90] sm:$0xff]  ;;  %v504_v6 = vld [vmem:[%s1760_s27 + $0x88] sm:$0xff]  ;;  %v503_v7 = vld [vmem:[%s1760_s27 + $0x80] sm:$0xff]  ;;  %s2127_s15 = sld [smem:[%s2179_s0 + %s1662_s12]]   ;;  %s1665_s24 = smov 28  }
  0x1b   :  { %v507_v33 = vld [vmem:[%s1493_s5] sm:$0xff]  ;;  %s1508_s19 = sld [smem:[%s2179_s0 + %s1663_s16]]   ;;  %s1666_s28 = smov 29  }
  0x1c   :  { %s1510_s23 = sld [smem:[%s2179_s0 + %s1664_s20]]   ;;  %s1667_s2 = smov 30  }
  0x86   :  { %v166_v9 = vpop.f32.mrf.mxu0 }
  0x87   :  { %v167_v10 = vadd.f32 %v1629_v8, %v166_v9 }
  0x89   :  { %v172_v11 = vmax.f32 %v167_v10, 0.0  ;;  %v178_v10 = vld [vmem:[%s1492_s1] sm:$0x3]  ;;  %s1514_s1 = sld [smem:[%s2179_s0 + %s1666_s28]]  }
  0x8a   :  { %v181_v15 = vperm.slane %v178_v10, 1 }
  0x8b   :  { %1520 = vmatmul.msk.f32.vlgmr.msra.gmra.mxu1 %vm184_vm3, %v172_v11  ;;  %1523 = vmatmul.msk.f32.vlgmr.msra.gmra.mxu2 %vm184_vm3, %v172_v11  ;;  %v180_v11 = vperm.slane %v178_v10, 0  ;;  %v1928_v10 = vld [vmem:[%s1855_s25 + $0x30] sm:$0xff] }
  0x8c   :  { %1534 = vmatpush.msk.msra.mxu1 %vm145_vm0, %v345_v19  ;;  %1548 = vmatpush.msk.msra.mxu2 %vm191_vm2, %v486_v44  ;;  %v1837_v44 = vld [vmem:[%s1501_s21 + $0x18] sm:$0xff] }
  0x8e   :  { %v169_v12 = vpop.f32.mrf.mxu0  ;;  %590 = vmatpush.msra.mxu2 %v484_v46  ;;  %v1632_v46 = vld [vmem:[%s1494_s9] ss:$0 sm:$0xff] }
  0x8f   :  { %v170_v13 = vadd.f32 %v1629_v8, %v169_v12 }
  0x91   :  { %v173_v14 = vmax.f32 %v170_v13, 0.0  ;;  %v272_v26 = vpop.f32.mrf.mxu3 }
  0x92   :  { %v273_v28 = vadd.f32 %v1630_v23, %v272_v26 }
  0x93   :  { %1521 = vmatmul.msk.f32.gmra.mxu1 %vm184_vm3, %v173_v14  ;;  %1524 = vmatmul.msk.f32.gmra.mxu2 %vm184_vm3, %v173_v14 }
  0x94   :  { %v276_v29 = vmax.f32 %v273_v28, 0.0 }
  0x9b   :  { %1526 = vmatmul.msk.f32.vlgmr.msrb.gmra.mxu1 %vm138_vm1, %v128_v1 }
  0x9c   :  { %1545 = vmatpush.msk.msrb.mxu1 %vm191_vm2, %v485_v43  ;;  %v1835_v43 = vld [vmem:[%s1501_s21 + $0x10] sm:$0xff] }
  0x9e   :  { %567 = vmatpush.msrb.mxu1 %v483_v45 }
  0xa3   :  { %1535 = vmatmul.msk.f32.vlgmr.msra.gmra.mxu1 %vm138_vm1, %v128_v1  ;;  %v488_v1 = vld [vmem:[%s1760_s27 + $0x8] sm:$0xff]  ;;  %s1513_s27 = sld [smem:[%s2179_s0 + %s1665_s24]]  }
  0xab   :  { %1536 = vmatmul.msk.f32.gmra.mxu1 %vm138_vm1, %v129_v2 }
 0x108   :  { %v1721_v21 = vpop.f32.mrf.mxu1 }
 0x109   :  { %v216_v13 = vadd.f32 %v1721_v21, %v180_v11 }
 0x10e   :  { %v238_v2 = vpop.f32.mrf.mxu2 }
 0x10f   :  { %v239_v17 = vadd.f32 %v238_v2, %v181_v15  ;;  %v1899_v2 = vld [vmem:[%s1855_s25 + $0xd0] sm:$0xff] }
 0x110   :  { %v1723_v22 = vpop.f32.mrf.mxu1 }
 0x111   :  { %v219_v19 = vadd.f32 %v1723_v22, %v180_v11  ;;  %v1931_v11 = vld [vmem:[%s1855_s25 + $0xb0] sm:$0xff] }
 0x116   :  { %v241_v8 = vpop.f32.mrf.mxu2 }
 0x117   :  { %v242_v26 = vadd.f32 %v241_v8, %v181_v15  ;;  %v1923_v8 = vld [vmem:[%s1855_s25 + $0xb8] sm:$0xff]  ;;  %v1944_v15 = vld [vmem:[%s1855_s25 + $0x20] sm:$0xff] }
 0x118   :  { %v269_v24 = vpop.f32.mrf.mxu1 }
 0x119   :  { %v270_v25 = vadd.f32 %v1630_v23, %v269_v24 }
 0x11b   :  { %v275_v27 = vmax.f32 %v270_v25, 0.0 }
 0x11d   :  { %1529 = vmatmul.msk.f32.vlgmr.msrb.gmra.mxu0 %vm184_vm3, %v275_v27  ;;  %1532 = vmatmul.msk.f32.vlgmr.msrb.gmra.mxu3 %vm184_vm3, %v275_v27 }
 0x11e   :  { %609 = vmatpush.msrb.mxu0 %v502_v47  ;;  %644 = vmatpush.msrb.mxu3 %v506_v4  ;;  %v1907_v4 = vld [vmem:[%s1855_s25 + $0xc8] sm:$0xff] }
 0x120   :  { %v370_v35 = vpop.f32.mrf.mxu1  ;;  %610 = vmatpush.msrb.mxu0 %v501_v48  ;;  %645 = vmatpush.msrb.mxu3 %v505_v5  ;;  %v1912_v5 = vld [vmem:[%s1855_s25 + $0x40] sm:$0xff] }
 0x121   :  { %v371_v36 = vadd.f32 %v1631_v32, %v370_v35 }
 0x122   :  { %611 = vmatpush.msrb.mxu0 %v500_v49  ;;  %646 = vmatpush.msrb.mxu3 %v504_v6  ;;  %v1915_v6 = vld [vmem:[%s1855_s25 + $0xc0] sm:$0xff] }
 0x123   :  { %v376_v37 = vmax.f32 %v371_v36, 0.0 }
 0x124   :  { %612 = vmatpush.msrb.mxu0 %v499_v50  ;;  %647 = vmatpush.msrb.mxu3 %v503_v7  ;;  %v1920_v7 = vld [vmem:[%s1855_s25 + $0x38] sm:$0xff] }
 0x125   :  { %1530 = vmatmul.msk.f32.gmra.mxu0 %vm184_vm3, %v276_v29  ;;  %1533 = vmatmul.msk.f32.gmra.mxu3 %vm184_vm3, %v276_v29 }
 0x126   :  { %1538 = vmatmul.msk.f32.vlgmr.msrb.gmra.mxu2 %vm184_vm3, %v376_v37  ;;  %613 = vmatpush.msrb.mxu0 %v498_v51  ;;  %v1846_v51 = vld [vmem:[%s1501_s21] sm:$0xff] }
 0x128   :  { %v373_v40 = vpop.f32.mrf.mxu1  ;;  %614 = vmatpush.msrb.mxu0 %v497_v53  ;;  %v1848_v53 = vld [vmem:[%s1501_s21 + $0x8] sm:$0xff] }
 0x129   :  { %v374_v41 = vadd.f32 %v1631_v32, %v373_v40  ;;  %v508_v32 = vld [vmem:[%s1493_s5 + $0x8] sm:$0x3]  ;;  %s1515_s5 = sld [smem:[%s2179_s0 + %s1667_s2]]  }
 0x12a   :  { %615 = vmatpush.msrb.mxu0 %v496_v57  ;;  %1553 = vmatpush.msk.msra.mxu1 %vm191_vm2, %v508_v32  ;;  %v1864_v57 = vld [vmem:[%s1855_s25 + $0x70] sm:$0xff]  ;;  %v466_v32 = vld [vmem:[%s1855_s25 + $0x80] sm:$0xff] }
 0x12b   :  { %v377_v42 = vmax.f32 %v374_v41, 0.0  ;;  %v1821_v41 = vld [vmem:[%s1488_s13] sm:$0xff] }
 0x12c   :  { %616 = vmatpush.msrb.mxu0 %v495_v58  ;;  %676 = vmatpush.msra.mxu1 %v507_v33  ;;  %v1869_v58 = vld [vmem:[%s1855_s25 + $0xf0] sm:$0xff]  ;;  %v281_v33 = vld [vmem:[%s1500_s29] sm:$0x3] }
 0x12d   :  { %1543 = vmatmul.msk.f32.vlgmr.msra.gmra.mxu3 %vm510_vm4, %v1735_v30  ;;  %1541 = vmatmul.msk.f32.vlgmr.msra.gmra.mxu0 %vm184_vm3, %v376_v37 }
 0x12e   :  { %1539 = vmatmul.msk.f32.gmra.mxu2 %vm184_vm3, %v377_v42  ;;  %617 = vmatpush.msrb.mxu0 %v494_v59  ;;  %v1872_v59 = vld [vmem:[%s1855_s25 + $0x68] sm:$0xff] }
 0x12f   :  { %779 = vmatpush.msra.mxu3 %v1837_v44 }
 0x130   :  { %618 = vmatpush.msrb.mxu0 %v493_v60  ;;  %v1875_v60 = vld [vmem:[%s1855_s25 + $0xe8] sm:$0xff] }
 0x131   :  { %780 = vmatpush.msra.mxu3 %v1848_v53 }
 0x132   :  { %619 = vmatpush.msrb.mxu0 %v492_v61  ;;  %v1880_v61 = vld [vmem:[%s1855_s25 + $0x60] sm:$0xff] }
 0x134   :  { %620 = vmatpush.msrb.mxu0 %v491_v62  ;;  %v1883_v62 = vld [vmem:[%s1855_s25 + $0xe0] sm:$0xff] }
 0x135   :  { %1544 = vmatmul.msk.f32.gmra.mxu3 %vm510_vm4, %v1739_v31  ;;  %1542 = vmatmul.msk.f32.gmra.mxu0 %vm184_vm3, %v377_v42  ;;  %v710_v42 = vld [vmem:[%s1828_s17] sm:$0xff] }
 0x136   :  { %621 = vmatpush.msrb.mxu0 %v490_v63  ;;  %v1888_v63 = vld [vmem:[%s1855_s25 + $0x58] sm:$0xff] }
 0x138   :  { %622 = vmatpush.msrb.mxu0 %v489_v0  ;;  %v1891_v0 = vld [vmem:[%s1855_s25 + $0xd8] sm:$0xff] }
 0x13a   :  { %623 = vmatpush.msrb.mxu0 %v488_v1  ;;  %v1896_v1 = vld [vmem:[%s1855_s25 + $0x50] sm:$0xff] }
 0x13c   :  { %624 = vmatpush.msrb.mxu0 %v487_v3  ;;  %v1904_v3 = vld [vmem:[%s1855_s25 + $0x48] sm:$0xff] }
 0x19a   :  { %v1801_v21 = vpop.f32.mrf.mxu0 }
 0x1a0   :  { %v1767_v52 = vpop.f32.mrf.mxu3 }
 0x1a2   :  { %v1803_v29 = vpop.f32.mrf.mxu0 }
 0x1a8   :  { %v1770_v54 = vpop.f32.mrf.mxu3 }
 0x1a9   :  { %v1793_v9 = vpop.f32.mrf.mxu2 }
 0x1aa   :  { %v1808_v22 = vpop.f32.mrf.mxu0 }
 0x1b0   :  { %v534_v55 = vpop.f32.mrf.mxu3 }
 0x1b1   :  { %1546 = vmatmul.msk.f32.vlgmr.msrb.gmra.mxu1 %vm184_vm3, %v534_v55  ;;  %1549 = vmatmul.msk.f32.vlgmr.msra.gmra.mxu2 %vm184_vm3, %v534_v55  ;;  %v1795_v12 = vpop.f32.mrf.mxu2  ;;  %v1858_v55 = vld [vmem:[%s1855_s25 + $0x78] sm:$0xff] }
 0x1b2   :  { %v1816_v34 = vpop.f32.mrf.mxu0 }
 0x1b8   :  { %v537_v56 = vpop.f32.mrf.mxu3 }
 0x1b9   :  { %1547 = vmatmul.msk.f32.gmra.mxu1 %vm184_vm3, %v537_v56  ;;  %1550 = vmatmul.msk.f32.gmra.mxu2 %vm184_vm3, %v537_v56  ;;  %v1861_v56 = vld [vmem:[%s1855_s25 + $0xf8] sm:$0xff] }
 0x1c1   :  { %1554 = vmatmul.msk.f32.vlgmr.msra.gmra.mxu1 %vm184_vm3, %v1717_v20  ;;  %v711_v20 = vld [vmem:[%s1828_s17 + $0x8] sm:$0xff] }
 0x1c2   :  { %855 = vmatpush.msra.mxu0 %v711_v20 }
 0x1c4   :  { %856 = vmatpush.msra.mxu0 %v710_v42 }
 0x22e   :  { %v569_v14 = vpop.f32.mrf.mxu1 }
 0x22f   :  { %v598_v16 = vmul.f32 %v569_v14, %v216_v13  ;;  %v1936_v13 = vld [vmem:[%s1855_s25 + $0x28] sm:$0xff] }
 0x230   :  { %v1939_v14 = vld [vmem:[%s1855_s25 + $0xa8] sm:$0xff] }
 0x231   :  { %625 = vmatmul.f32.vlgmr.msrb.gmra.mxu0 %v598_v16  ;;  %v1947_v16 = vld [vmem:[%s1855_s25 + $0xa0] sm:$0xff] }
 0x234   :  { %v592_v18 = vpop.f32.mrf.mxu2 }
 0x235   :  { %v599_v23 = vmul.f32 %v592_v18, %v239_v17  ;;  %v1952_v17 = vld [vmem:[%s1855_s25 + $0x18] sm:$0xff] }
 0x236   :  { %v572_v24 = vpop.f32.mrf.mxu1  ;;  %v1955_v18 = vld [vmem:[%s1855_s25 + $0x98] sm:$0xff] }
 0x237   :  { %v600_v25 = vmul.f32 %v572_v24, %v219_v19  ;;  %1551 = vmatmul.msk.f32.vlgmr.msrb.gmra.mxu3 %vm602_vm5, %v599_v23  ;;  %v1962_v23 = vld [vmem:[%s1855_s25 + $0x10] sm:$0xff] }
 0x238   :  { %v1965_v24 = vld [vmem:[%s1855_s25 + $0x90] sm:$0xff] }
 0x239   :  { %628 = vmatmul.f32.gmra.mxu0 %v600_v25 }
 0x23c   :  { %v595_v27 = vpop.f32.mrf.mxu2 }
 0x23d   :  { %v601_v28 = vmul.f32 %v595_v27, %v242_v26  ;;  %v1974_v26 = vld [vmem:[%s1855_s25 + $0x8] sm:$0xff] }
 0x23e   :  { %v678_v45 = vpop.f32.mrf.mxu1  ;;  %v467_v27 = vld [vmem:[%s1855_s25 + $0x88] sm:$0xff] }
 0x23f   :  { %1552 = vmatmul.msk.f32.gmra.mxu3 %vm602_vm5, %v601_v28  ;;  %v1979_v28 = vld [vmem:[%s1855_s25] sm:$0xff] }
 0x2ae   :  { %v626_v35 = vpop.f32.mrf.mxu0 }
 0x2b6   :  { %v629_v37 = vpop.f32.mrf.mxu0 }
 0x2ba   :  { %v649_v36 = vpop.f32.mrf.mxu3 }
 0x2bb   :  { %v650_v40 = vadd.f32 %v649_v36, %v626_v35  ;;  %v283_v35 = vperm.slane %v281_v33, 0  ;;  %v284_v36 = vperm.slane %v281_v33, 1 }
 0x2c2   :  { %v652_v38 = vpop.f32.mrf.mxu3 }
 0x2c3   :  { %v653_v39 = vadd.f32 %v652_v38, %v629_v37  ;;  %v2001_v37 = vadd.f32 %v1801_v21, %v283_v35  ;;  %v2004_v38 = vadd.f32 %v1767_v52, %v284_v36  ;;  %v2011_v21 = vadd.f32 %v1803_v29, %v283_v35 }
 0x2c4   :  { %v2014_v52 = vadd.f32 %v1770_v54, %v284_v36 }
 0x2c5   :  { %699 = vmatpush.msrb.mxu2 %v653_v39 }
 0x2c7   :  { %700 = vmatpush.msrb.mxu2 %v650_v40 }
 0x2c8   :  { %1555 = vmatmul.msk.f32.vlgmr.msrb.gmra.mxu2 %vm681_vm6, %v1821_v41 }
 0x2c9   :  { %756 = vmatpush.msra.mxu2 %v1835_v43 }
 0x2cb   :  { %757 = vmatpush.msra.mxu2 %v1846_v51 }
 0x2cd   :  { %815 = vmatpush.msrb.mxu2 %v1861_v56 }
 0x2cf   :  { %816 = vmatpush.msrb.mxu2 %v1869_v58 }
 0x2d1   :  { %817 = vmatpush.msrb.mxu2 %v1875_v60 }
 0x2d3   :  { %818 = vmatpush.msrb.mxu2 %v1883_v62 }
 0x2d5   :  { %819 = vmatpush.msrb.mxu2 %v1891_v0 }
 0x2d7   :  { %820 = vmatpush.msrb.mxu2 %v1899_v2 }
 0x2d9   :  { %821 = vmatpush.msrb.mxu2 %v1907_v4 }
 0x2db   :  { %822 = vmatpush.msrb.mxu2 %v1915_v6 }
 0x2dd   :  { %823 = vmatpush.msrb.mxu2 %v1923_v8 }
 0x2df   :  { %824 = vmatpush.msrb.mxu2 %v1931_v11 }
 0x2e1   :  { %825 = vmatpush.msrb.mxu2 %v1939_v14 }
 0x2e3   :  { %826 = vmatpush.msrb.mxu2 %v1947_v16 }
 0x2e5   :  { %827 = vmatpush.msrb.mxu2 %v1955_v18 }
 0x2e7   :  { %828 = vmatpush.msrb.mxu2 %v1965_v24 }
 0x2e9   :  { %829 = vmatpush.msrb.mxu2 %v467_v27 }
 0x2eb   :  { %830 = vmatpush.msrb.mxu2 %v466_v32 }
 0x34b   :  { %v702_v47 = vpop.f32.mrf.mxu2 }
 0x34c   :  { %v703_v48 = vadd.f32 %v702_v47, %v678_v45 }
 0x34e   :  { %v708_v49 = vadd.f32 %v1632_v46, %v703_v48 }
 0x350   :  { %v709_v50 = vmax.f32 %v708_v49, 0.0 }
 0x352   :  { %728 = vmatpush.msrb.mxu1 %v709_v50  ;;  %1562 = vmatmul.msk.f32.vlgmr.msra.gmra.mxu0 %vm681_vm6, %v709_v50 }
 0x353   :  { %1556 = vmatmul.msk.f32.vlgmr.msrb.gmra.mxu1 %vm510_vm4, %v1735_v30 }
 0x354   :  { %792 = vmatpush.msra.mxu1 %v1858_v55 }
 0x356   :  { %793 = vmatpush.msra.mxu1 %v1864_v57 }
 0x358   :  { %794 = vmatpush.msra.mxu1 %v1872_v59 }
 0x35a   :  { %795 = vmatpush.msra.mxu1 %v1880_v61 }
 0x35b   :  { %1557 = vmatmul.msk.f32.gmra.mxu1 %vm510_vm4, %v1739_v31 }
 0x35c   :  { %796 = vmatpush.msra.mxu1 %v1888_v63 }
 0x35e   :  { %797 = vmatpush.msra.mxu1 %v1896_v1 }
 0x360   :  { %798 = vmatpush.msra.mxu1 %v1904_v3 }
 0x362   :  { %799 = vmatpush.msra.mxu1 %v1912_v5 }
 0x364   :  { %800 = vmatpush.msra.mxu1 %v1920_v7 }
 0x366   :  { %801 = vmatpush.msra.mxu1 %v1928_v10 }
 0x368   :  { %802 = vmatpush.msra.mxu1 %v1936_v13 }
 0x36a   :  { %803 = vmatpush.msra.mxu1 %v1944_v15 }
 0x36c   :  { %804 = vmatpush.msra.mxu1 %v1952_v17 }
 0x36e   :  { %805 = vmatpush.msra.mxu1 %v1962_v23 }
 0x370   :  { %806 = vmatpush.msra.mxu1 %v1974_v26 }
 0x372   :  { %807 = vmatpush.msra.mxu1 %v1979_v28 }
 0x374   :  { %993 = vmatpush.msrb.mxu1 %v1861_v56 }
 0x376   :  { %994 = vmatpush.msrb.mxu1 %v1869_v58 }
 0x378   :  { %995 = vmatpush.msrb.mxu1 %v1875_v60 }
 0x37a   :  { %996 = vmatpush.msrb.mxu1 %v1883_v62 }
 0x37c   :  { %997 = vmatpush.msrb.mxu1 %v1891_v0 }
 0x37e   :  { %998 = vmatpush.msrb.mxu1 %v1899_v2 }
 0x380   :  { %999 = vmatpush.msrb.mxu1 %v1907_v4 }
 0x382   :  { %1000 = vmatpush.msrb.mxu1 %v1915_v6 }
 0x384   :  { %1001 = vmatpush.msrb.mxu1 %v1923_v8 }
 0x386   :  { %1002 = vmatpush.msrb.mxu1 %v1931_v11 }
 0x388   :  { %1003 = vmatpush.msrb.mxu1 %v1939_v14 }
 0x38a   :  { %1004 = vmatpush.msrb.mxu1 %v1947_v16 }
 0x38c   :  { %1005 = vmatpush.msrb.mxu1 %v1955_v18 }
 0x38e   :  { %1006 = vmatpush.msrb.mxu1 %v1965_v24 }
 0x390   :  { %1007 = vmatpush.msrb.mxu1 %v467_v27 }
 0x392   :  { %1008 = vmatpush.msrb.mxu1 %v466_v32 }
 0x3d0   :  { %v730_v19 = vpop.f32.mrf.mxu1 }
 0x3d1   :  { %1558 = vmatmul.msk.f32.vlgmr.msra.gmra.mxu2 %vm681_vm6, %v730_v19  ;;  %1560 = vmatmul.msk.f32.vlgmr.msra.gmra.mxu3 %vm681_vm6, %v730_v19 }
 0x3d8   :  { %v733_v25 = vpop.f32.mrf.mxu1 }
 0x3d9   :  { %1559 = vmatmul.msk.f32.gmra.mxu2 %vm681_vm6, %v733_v25  ;;  %1561 = vmatmul.msk.f32.gmra.mxu3 %vm681_vm6, %v733_v25 }
 0x454   :  { %v759_v39 = vpop.f32.mrf.mxu2  ;;  %v782_v40 = vpop.f32.mrf.mxu3 }
 0x455   :  { %v788_v20 = vmul.f32 %v759_v39, %v2001_v37  ;;  %v789_v42 = vmul.f32 %v782_v40, %v2004_v38 }
 0x457   :  { %808 = vmatmul.f32.vlgmr.msra.gmra.mxu1 %v788_v20  ;;  %831 = vmatmul.f32.vlgmr.msrb.gmra.mxu2 %v789_v42 }
 0x458   :  { %1171 = vmatpush.msra.mxu1 %v1861_v56 }
 0x45a   :  { %1172 = vmatpush.msra.mxu1 %v1869_v58 }
 0x45c   :  { %v762_v45 = vpop.f32.mrf.mxu2  ;;  %v785_v46 = vpop.f32.mrf.mxu3  ;;  %1173 = vmatpush.msra.mxu1 %v1875_v60  ;;  %v1565_v60 = vld [vmem:[%s1828_s17 + $0x18] sm:$0xff] }
 0x45d   :  { %v790_v47 = vmul.f32 %v762_v45, %v2011_v21  ;;  %v791_v48 = vmul.f32 %v785_v46, %v2014_v52  ;;  %1033 = vmatpush.msra.mxu2 %v1565_v60  ;;  %v1243_v60 = vld [vmem:[%s1511_s7 + $0x8] sm:$0xff] }
 0x45e   :  { %1174 = vmatpush.msra.mxu1 %v1883_v62  ;;  %v1564_v62 = vld [vmem:[%s1828_s17 + $0x10] sm:$0xff] }
 0x45f   :  { %811 = vmatmul.f32.gmra.mxu1 %v790_v47  ;;  %834 = vmatmul.f32.gmra.mxu2 %v791_v48 }
 0x460   :  { %1175 = vmatpush.msra.mxu1 %v1891_v0  ;;  %1034 = vmatpush.msra.mxu2 %v1564_v62  ;;  %v1633_v0 = vld [vmem:[%s2028_s3] ss:$0 sm:$0xff]  ;;  %v1267_v62 = vld [vmem:[%s1509_s11 + $0x8] sm:$0xff] }
 0x462   :  { %1176 = vmatpush.msra.mxu1 %v1899_v2  ;;  %v858_v2 = vpop.f32.mrf.mxu0 }
 0x464   :  { %1177 = vmatpush.msra.mxu1 %v1907_v4 }
 0x466   :  { %1178 = vmatpush.msra.mxu1 %v1915_v6 }
 0x468   :  { %1179 = vmatpush.msra.mxu1 %v1923_v8 }
 0x46a   :  { %1180 = vmatpush.msra.mxu1 %v1931_v11 }
 0x46c   :  { %1181 = vmatpush.msra.mxu1 %v1939_v14 }
 0x46e   :  { %1182 = vmatpush.msra.mxu1 %v1947_v16 }
 0x470   :  { %1183 = vmatpush.msra.mxu1 %v1955_v18 }
 0x472   :  { %1184 = vmatpush.msra.mxu1 %v1965_v24 }
 0x474   :  { %1185 = vmatpush.msra.mxu1 %v467_v27 }
 0x476   :  { %1186 = vmatpush.msra.mxu1 %v466_v32 }
 0x4d4   :  { %v809_v54 = vpop.f32.mrf.mxu1 }
 0x4da   :  { %v832_v29 = vpop.f32.mrf.mxu2 }
 0x4db   :  { %v833_v58 = vadd.f32 %v832_v29, %v809_v54 }
 0x4dc   :  { %v812_v49 = vpop.f32.mrf.mxu1 }
 0x4e2   :  { %v835_v50 = vpop.f32.mrf.mxu2 }
 0x4e3   :  { %v836_v56 = vadd.f32 %v835_v50, %v812_v49 }
 0x4e5   :  { %875 = vmatpush.msrb.mxu3 %v836_v56  ;;  %v1245_v56 = vld [vmem:[%s1511_s7 + $0x18] sm:$0xff] }
 0x4e7   :  { %876 = vmatpush.msrb.mxu3 %v833_v58  ;;  %v1242_v58 = vld [vmem:[%s1511_s7] sm:$0xff] }
 0x4e8   :  { %1563 = vmatmul.msk.f32.vlgmr.msrb.gmra.mxu3 %vm681_vm6, %v1821_v41 }
 0x4e9   :  { %934 = vmatpush.msra.mxu3 %v1835_v43 }
 0x4eb   :  { %935 = vmatpush.msra.mxu3 %v1846_v51 }
 0x4ed   :  { %970 = vmatpush.msrb.mxu3 %v1858_v55 }
 0x4ef   :  { %971 = vmatpush.msrb.mxu3 %v1864_v57 }
 0x4f1   :  { %972 = vmatpush.msrb.mxu3 %v1872_v59 }
 0x4f3   :  { %973 = vmatpush.msrb.mxu3 %v1880_v61 }
 0x4f5   :  { %974 = vmatpush.msrb.mxu3 %v1888_v63 }
 0x4f7   :  { %975 = vmatpush.msrb.mxu3 %v1896_v1 }
 0x4f9   :  { %976 = vmatpush.msrb.mxu3 %v1904_v3 }
 0x4fb   :  { %977 = vmatpush.msrb.mxu3 %v1912_v5 }
 0x4fd   :  { %978 = vmatpush.msrb.mxu3 %v1920_v7 }
 0x4ff   :  { %979 = vmatpush.msrb.mxu3 %v1928_v10 }
 0x501   :  { %980 = vmatpush.msrb.mxu3 %v1936_v13 }
 0x503   :  { %981 = vmatpush.msrb.mxu3 %v1944_v15 }
 0x505   :  { %982 = vmatpush.msrb.mxu3 %v1952_v17 }
 0x507   :  { %983 = vmatpush.msrb.mxu3 %v1962_v23 }
 0x509   :  { %984 = vmatpush.msrb.mxu3 %v1974_v26 }
 0x50b   :  { %985 = vmatpush.msrb.mxu3 %v1979_v28 }
 0x56b   :  { %v878_v4 = vpop.f32.mrf.mxu3 }
 0x56c   :  { %v879_v6 = vadd.f32 %v878_v4, %v858_v2  ;;  %v1259_v2 = vld [vmem:[%s2127_s15 + $0x68] sm:$0xff]  ;;  %v1265_v4 = vld [vmem:[%s2127_s15 + $0x98] sm:$0xff] }
 0x56e   :  { %v884_v8 = vadd.f32 %v1633_v0, %v879_v6  ;;  %v1266_v0 = vld [vmem:[%s1509_s11] sm:$0xff] }
 0x56f   :  { %v1258_v6 = vld [vmem:[%s2127_s15 + $0x60] sm:$0xff] }
 0x570   :  { %v885_v11 = vmax.f32 %v884_v8, 0.0  ;;  %v1264_v8 = vld [vmem:[%s2127_s15 + $0x90] sm:$0xff] }
 0x572   :  { %906 = vmatpush.msrb.mxu0 %v885_v11  ;;  %1573 = vmatmul.msk.f32.vlgmr.msra.gmra.mxu2 %vm681_vm6, %v885_v11  ;;  %v1257_v11 = vld [vmem:[%s2127_s15 + $0x58] sm:$0xff] }
 0x573   :  { %1567 = vmatmul.msk.f32.vlgmr.msrb.gmra.mxu0 %vm510_vm4, %v1735_v30 }
 0x574   :  { %957 = vmatpush.msra.mxu0 %v1837_v44 }
 0x576   :  { %958 = vmatpush.msra.mxu0 %v1848_v53 }
 0x57b   :  { %1568 = vmatmul.msk.f32.gmra.mxu0 %vm510_vm4, %v1739_v31 }
 0x5f0   :  { %v908_v14 = vpop.f32.mrf.mxu0 }
 0x5f1   :  { %1569 = vmatmul.msk.f32.vlgmr.msra.gmra.mxu3 %vm681_vm6, %v908_v14  ;;  %1571 = vmatmul.msk.f32.vlgmr.msra.gmra.mxu0 %vm681_vm6, %v908_v14  ;;  %v1256_v14 = vld [vmem:[%s2127_s15 + $0x50] sm:$0xff] }
 0x5f2   :  { %1148 = vmatpush.msra.mxu3 %v1858_v55 }
 0x5f4   :  { %1149 = vmatpush.msra.mxu3 %v1864_v57 }
 0x5f5   :  { %v1036_v19 = vpop.f32.mrf.mxu2 }
 0x5f6   :  { %1150 = vmatpush.msra.mxu3 %v1872_v59 }
 0x5f8   :  { %v911_v16 = vpop.f32.mrf.mxu0  ;;  %1151 = vmatpush.msra.mxu3 %v1880_v61 }
 0x5f9   :  { %1570 = vmatmul.msk.f32.gmra.mxu3 %vm681_vm6, %v911_v16  ;;  %1572 = vmatmul.msk.f32.gmra.mxu0 %vm681_vm6, %v911_v16  ;;  %v1255_v16 = vld [vmem:[%s2127_s15 + $0x48] sm:$0xff] }
 0x5fa   :  { %1152 = vmatpush.msra.mxu3 %v1888_v63 }
 0x5fc   :  { %1153 = vmatpush.msra.mxu3 %v1896_v1 }
 0x5fe   :  { %1154 = vmatpush.msra.mxu3 %v1904_v3 }
 0x600   :  { %1155 = vmatpush.msra.mxu3 %v1912_v5 }
 0x602   :  { %1156 = vmatpush.msra.mxu3 %v1920_v7 }
 0x604   :  { %1157 = vmatpush.msra.mxu3 %v1928_v10 }
 0x606   :  { %1158 = vmatpush.msra.mxu3 %v1936_v13 }
 0x608   :  { %1159 = vmatpush.msra.mxu3 %v1944_v15 }
 0x60a   :  { %1160 = vmatpush.msra.mxu3 %v1952_v17 }
 0x60c   :  { %1161 = vmatpush.msra.mxu3 %v1962_v23  ;;  %v1634_v23 = vld [vmem:[%s2028_s3 + $0x1] ss:$0 sm:$0xff] }
 0x60e   :  { %1162 = vmatpush.msra.mxu3 %v1974_v26 }
 0x610   :  { %1163 = vmatpush.msra.mxu3 %v1979_v28  ;;  %v1575_v28 = vld [vmem:[%s1828_s17 + $0x20] sm:$0xff] }
 0x66e   :  { %v960_v55 = vpop.f32.mrf.mxu0 }
 0x66f   :  { %v967_v57 = vmul.f32 %v960_v55, %v2004_v38  ;;  %v1254_v55 = vld [vmem:[%s2127_s15 + $0x40] sm:$0xff] }
 0x671   :  { %1009 = vmatmul.f32.vlgmr.msrb.gmra.mxu1 %v967_v57  ;;  %v1253_v57 = vld [vmem:[%s2127_s15 + $0x38] sm:$0xff] }
 0x672   :  { %1389 = vmatpush.msrb.mxu1 %v1265_v4 }
 0x674   :  { %v937_v59 = vpop.f32.mrf.mxu3  ;;  %1390 = vmatpush.msrb.mxu1 %v1264_v8 }
 0x675   :  { %v966_v61 = vmul.f32 %v937_v59, %v2001_v37 }
 0x676   :  { %v963_v63 = vpop.f32.mrf.mxu0 }
 0x677   :  { %v969_v1 = vmul.f32 %v963_v63, %v2014_v52  ;;  %986 = vmatmul.f32.vlgmr.msrb.gmra.mxu3 %v966_v61  ;;  %v1252_v61 = vld [vmem:[%s2127_s15 + $0x30] sm:$0xff]  ;;  %v1251_v63 = vld [vmem:[%s2127_s15 + $0x28] sm:$0xff] }
 0x679   :  { %1012 = vmatmul.f32.gmra.mxu1 %v969_v1 }
 0x67c   :  { %v940_v3 = vpop.f32.mrf.mxu3 }
 0x67d   :  { %v968_v5 = vmul.f32 %v940_v3, %v2011_v21  ;;  %v1250_v3 = vld [vmem:[%s2127_s15 + $0x20] sm:$0xff] }
 0x67f   :  { %989 = vmatmul.f32.gmra.mxu3 %v968_v5  ;;  %v1263_v5 = vld [vmem:[%s2127_s15 + $0x88] sm:$0xff] }
 0x680   :  { %1391 = vmatpush.msrb.mxu1 %v1263_v5 }
 0x6ee   :  { %v1010_v7 = vpop.f32.mrf.mxu1 }
 0x6f6   :  { %v1013_v13 = vpop.f32.mrf.mxu1 }
 0x6fa   :  { %v987_v10 = vpop.f32.mrf.mxu3 }
 0x6fb   :  { %v1011_v18 = vadd.f32 %v1010_v7, %v987_v10  ;;  %v1249_v7 = vld [vmem:[%s2127_s15 + $0x18] sm:$0xff]  ;;  %v1262_v10 = vld [vmem:[%s2127_s15 + $0x80] sm:$0xff] }
 0x6fc   :  { %1392 = vmatpush.msrb.mxu1 %v1262_v10 }
 0x702   :  { %v990_v15 = vpop.f32.mrf.mxu3 }
 0x703   :  { %v1014_v17 = vadd.f32 %v1013_v13, %v990_v15  ;;  %v1248_v13 = vld [vmem:[%s2127_s15 + $0x10] sm:$0xff]  ;;  %v1247_v15 = vld [vmem:[%s2127_s15 + $0x8] sm:$0xff] }
 0x705   :  { %1053 = vmatpush.msrb.mxu2 %v1014_v17  ;;  %v1246_v17 = vld [vmem:[%s2127_s15] sm:$0xff] }
 0x707   :  { %1054 = vmatpush.msrb.mxu2 %v1011_v18  ;;  %v382_v18 = vld [vmem:[%s1508_s19] sm:$0x3] }
 0x708   :  { %1574 = vmatmul.msk.f32.vlgmr.msrb.gmra.mxu2 %vm681_vm6, %v1821_v41 }
 0x709   :  { %1112 = vmatpush.msra.mxu2 %v1835_v43  ;;  %v1576_v43 = vld [vmem:[%s1828_s17 + $0x28] sm:$0xff] }
 0x70b   :  { %1113 = vmatpush.msra.mxu2 %v1846_v51 }
 0x70d   :  { %1211 = vmatpush.msrb.mxu2 %v1576_v43 }
 0x70f   :  { %1212 = vmatpush.msrb.mxu2 %v1575_v28 }
 0x78b   :  { %v1056_v24 = vpop.f32.mrf.mxu2 }
 0x78c   :  { %v1057_v25 = vadd.f32 %v1056_v24, %v1036_v19  ;;  %v385_v19 = vperm.slane %v382_v18, 1 }
 0x78e   :  { %v1062_v26 = vadd.f32 %v1634_v23, %v1057_v25  ;;  %v441_v23 = vadd.f32 %v1808_v22, %v385_v19  ;;  %v384_v25 = vperm.slane %v382_v18, 0  ;;  %v444_v28 = vadd.f32 %v1816_v34, %v385_v19 }
 0x790   :  { %v1063_v27 = vmax.f32 %v1062_v26, 0.0 }
 0x792   :  { %1084 = vmatpush.msrb.mxu0 %v1063_v27 }
 0x793   :  { %1578 = vmatmul.msk.f32.vlgmr.msrb.gmra.mxu0 %vm510_vm4, %v1735_v30 }
 0x794   :  { %1135 = vmatpush.msra.mxu0 %v1837_v44 }
 0x796   :  { %1136 = vmatpush.msra.mxu0 %v1848_v53 }
 0x79b   :  { %1579 = vmatmul.msk.f32.gmra.mxu0 %vm510_vm4, %v1739_v31 }
 0x810   :  { %v1086_v51 = vpop.f32.mrf.mxu0 }
 0x811   :  { %1580 = vmatmul.msk.f32.vlgmr.msra.gmra.mxu2 %vm681_vm6, %v1086_v51  ;;  %1582 = vmatmul.msk.f32.vlgmr.msra.gmra.mxu0 %vm681_vm6, %v1086_v51 }
 0x818   :  { %v1089_v32 = vpop.f32.mrf.mxu0 }
 0x819   :  { %1581 = vmatmul.msk.f32.gmra.mxu2 %vm681_vm6, %v1089_v32  ;;  %1583 = vmatmul.msk.f32.gmra.mxu0 %vm681_vm6, %v1089_v32 }
 0x821   :  { %1584 = vmatmul.msk.f32.vlgmr.msrb.gmra.mxu2 %vm681_vm6, %v1063_v27  ;;  %v418_v27 = vadd.f32 %v1793_v9, %v384_v25 }
 0x88e   :  { %v1138_v44 = vpop.f32.mrf.mxu0 }
 0x88f   :  { %v1145_v53 = vmul.f32 %v1138_v44, %v2004_v38 }
 0x891   :  { %1187 = vmatmul.f32.vlgmr.msra.gmra.mxu1 %v1145_v53  ;;  %v421_v53 = vadd.f32 %v1795_v12, %v384_v25  ;;  %v1449_v12 = vld [vmem:[%s1513_s27 + $0x8] sm:$0x3] }
 0x894   :  { %v1115_v33 = vpop.f32.mrf.mxu2 }
 0x895   :  { %v1144_v35 = vmul.f32 %v1115_v33, %v2001_v37  ;;  %v1244_v37 = vld [vmem:[%s1511_s7 + $0x10] sm:$0xff] }
 0x896   :  { %v1141_v36 = vpop.f32.mrf.mxu0 }
 0x897   :  { %v1147_v39 = vmul.f32 %v1141_v36, %v2014_v52  ;;  %1164 = vmatmul.f32.vlgmr.msra.gmra.mxu3 %v1144_v35  ;;  %v1635_v52 = vld [vmem:[%s2028_s3 + $0x2] ss:$0 sm:$0xff] }
 0x899   :  { %1190 = vmatmul.f32.gmra.mxu1 %v1147_v39 }
 0x89c   :  { %v1118_v40 = vpop.f32.mrf.mxu2 }
 0x89d   :  { %v1146_v20 = vmul.f32 %v1118_v40, %v2011_v21 }
 0x89f   :  { %1167 = vmatmul.f32.gmra.mxu3 %v1146_v20  ;;  %v1448_v20 = vld [vmem:[%s1513_s27] sm:$0xff] }
 0x8a4   :  { %v1214_v21 = vpop.f32.mrf.mxu2 }
 0x90e   :  { %v1188_v42 = vpop.f32.mrf.mxu1 }
 0x916   :  { %v1191_v46 = vpop.f32.mrf.mxu1 }
 0x91a   :  { %v1165_v45 = vpop.f32.mrf.mxu3 }
 0x91b   :  { %v1189_v38 = vadd.f32 %v1188_v42, %v1165_v45  ;;  %v66_v42 = vstv %s1514_s1 }
 0x91c   :  { %67 = vst [vmem:[#allocation2] sm:$0x1] %v66_v42 }
 0x922   :  { %v1168_v47 = vpop.f32.mrf.mxu3 }
 0x923   :  { %v1192_v48 = vadd.f32 %v1191_v46, %v1168_v47  ;;  %v1636_v46 = vld [vmem:[%s1510_s23] ss:$0 sm:$0xff] }
 0x925   :  { %1231 = vmatpush.msra.mxu2 %v1192_v48 }
 0x927   :  { %1232 = vmatpush.msra.mxu2 %v1189_v38 }
 0x928   :  { %1585 = vmatmul.msk.f32.vlgmr.msra.gmra.mxu2 %vm681_vm6, %v1821_v41 }
 0x929   :  { %1312 = vmatpush.msrb.mxu2 %v1244_v37  ;;  %v1637_v37 = vld [vmem:[#allocation2] ss:$0 sm:$0xff] }
 0x92b   :  { %1313 = vmatpush.msrb.mxu2 %v1242_v58 }
 0x92d   :  { %1417 = vmatpush.msra.mxu2 %v1267_v62 }
 0x92f   :  { %1418 = vmatpush.msra.mxu2 %v1266_v0 }
 0x9ab   :  { %v1234_v54 = vpop.f32.mrf.mxu2 }
 0x9ac   :  { %v1235_v29 = vadd.f32 %v1234_v54, %v1214_v21 }
 0x9ae   :  { %v1240_v49 = vadd.f32 %v1635_v52, %v1235_v29 }
 0x9b0   :  { %v1241_v50 = vmax.f32 %v1240_v49, 0.0 }
 0x9b2   :  { %1284 = vmatpush.msrb.mxu0 %v1241_v50 }
 0x9b3   :  { %1586 = vmatmul.msk.f32.vlgmr.msrb.gmra.mxu0 %vm510_vm4, %v1735_v30  ;;  %v1261_v30 = vld [vmem:[%s2127_s15 + $0x78] sm:$0xff] }
 0x9b4   :  { %1335 = vmatpush.msra.mxu0 %v1245_v56  ;;  %1354 = vmatpush.msrb.mxu3 %v1261_v30 }
 0x9b6   :  { %1336 = vmatpush.msra.mxu0 %v1243_v60 }
 0x9b8   :  { %1596 = vmatpush.msk.msrb.mxu0 %vm191_vm2, %v1449_v12 }
 0x9ba   :  { %1475 = vmatpush.msrb.mxu0 %v1448_v20 }
 0x9bb   :  { %1587 = vmatmul.msk.f32.gmra.mxu0 %vm510_vm4, %v1739_v31  ;;  %v1260_v31 = vld [vmem:[%s2127_s15 + $0x70] sm:$0xff] }
 0x9bc   :  { %1355 = vmatpush.msrb.mxu3 %v1260_v31 }
 0x9be   :  { %1356 = vmatpush.msrb.mxu3 %v1259_v2 }
 0x9c0   :  { %1357 = vmatpush.msrb.mxu3 %v1258_v6 }
 0x9c2   :  { %1358 = vmatpush.msrb.mxu3 %v1257_v11 }
 0x9c4   :  { %1359 = vmatpush.msrb.mxu3 %v1256_v14 }
 0x9c6   :  { %1360 = vmatpush.msrb.mxu3 %v1255_v16 }
 0x9c8   :  { %1361 = vmatpush.msrb.mxu3 %v1254_v55 }
 0x9ca   :  { %1362 = vmatpush.msrb.mxu3 %v1253_v57 }
 0x9cc   :  { %1363 = vmatpush.msrb.mxu3 %v1252_v61 }
 0x9ce   :  { %1364 = vmatpush.msrb.mxu3 %v1251_v63 }
 0x9d0   :  { %1365 = vmatpush.msrb.mxu3 %v1250_v3 }
 0x9d2   :  { %1366 = vmatpush.msrb.mxu3 %v1249_v7 }
 0x9d4   :  { %1367 = vmatpush.msrb.mxu3 %v1248_v13 }
 0x9d6   :  { %1368 = vmatpush.msrb.mxu3 %v1247_v15 }
 0x9d8   :  { %1369 = vmatpush.msrb.mxu3 %v1246_v17 }
 0xa30   :  { %v1286_v59 = vpop.f32.mrf.mxu0 }
 0xa31   :  { %1588 = vmatmul.msk.f32.vlgmr.msrb.gmra.mxu2 %vm681_vm6, %v1286_v59  ;;  %1590 = vmatmul.msk.f32.vlgmr.msra.gmra.mxu0 %vm681_vm6, %v1286_v59 }
 0xa38   :  { %v1289_v1 = vpop.f32.mrf.mxu0 }
 0xa39   :  { %1589 = vmatmul.msk.f32.gmra.mxu2 %vm681_vm6, %v1289_v1  ;;  %1591 = vmatmul.msk.f32.gmra.mxu0 %vm681_vm6, %v1289_v1 }
 0xa41   :  { %1594 = vmatmul.msk.f32.vlgmr.msra.gmra.mxu2 %vm681_vm6, %v1241_v50 }
 0xaae   :  { %v1338_v24 = vpop.f32.mrf.mxu0 }
 0xaaf   :  { %v1345_v26 = vmul.f32 %v1338_v24, %v441_v23 }
 0xab1   :  { %1592 = vmatmul.msk.f32.vlgmr.msrb.gmra.mxu1 %vm602_vm5, %v1345_v26 }
 0xab4   :  { %v1315_v43 = vpop.f32.mrf.mxu2 }
 0xab5   :  { %v1344_v51 = vmul.f32 %v1315_v43, %v418_v27 }
 0xab6   :  { %v1341_v32 = vpop.f32.mrf.mxu0 }
 0xab7   :  { %v1347_v44 = vmul.f32 %v1341_v32, %v444_v28  ;;  %1370 = vmatmul.f32.vlgmr.msrb.gmra.mxu3 %v1344_v51 }
 0xab9   :  { %1593 = vmatmul.msk.f32.gmra.mxu1 %vm602_vm5, %v1347_v44 }
 0xabc   :  { %v1318_v33 = vpop.f32.mrf.mxu2 }
 0xabd   :  { %v1346_v22 = vmul.f32 %v1318_v33, %v421_v53 }
 0xabf   :  { %1373 = vmatmul.f32.gmra.mxu3 %v1346_v22 }
 0xac4   :  { %v1420_v45 = vpop.f32.mrf.mxu2 }
 0xb2e   :  { %v1394_v9 = vpop.f32.mrf.mxu1 }
 0xb36   :  { %v1397_v36 = vpop.f32.mrf.mxu1 }
 0xb3a   :  { %v1371_v35 = vpop.f32.mrf.mxu3 }
 0xb3b   :  { %v1395_v40 = vadd.f32 %v1394_v9, %v1371_v35 }
 0xb42   :  { %v1374_v34 = vpop.f32.mrf.mxu3 }
 0xb43   :  { %v1398_v39 = vadd.f32 %v1397_v36, %v1374_v34 }
 0xb45   :  { %1437 = vmatpush.msrb.mxu2 %v1398_v39 }
 0xb47   :  { %1438 = vmatpush.msrb.mxu2 %v1395_v40 }
 0xb48   :  { %1595 = vmatmul.msk.f32.vlgmr.msrb.gmra.mxu2 %vm681_vm6, %v1821_v41 }
 0xbcb   :  { %v1440_v41 = vpop.f32.mrf.mxu2 }
 0xbcc   :  { %v1441_v47 = vadd.f32 %v1440_v41, %v1420_v45 }
 0xbce   :  { %v1446_v48 = vadd.f32 %v1636_v46, %v1441_v47 }
 0xbd0   :  { %v1447_v38 = vmax.f32 %v1446_v48, 0.0 }
 0xbd2   :  { %1597 = vmatmul.msk.f32.vlgmr.msrb.gmra.mxu0 %vm184_vm3, %v1447_v38 }
 0xc4f   :  { %v1477_v21 = vpop.f32.mrf.mxu0 }
 0xc50   :  { %v1478_v52 = vadd.f32 %v1637_v37, %v1477_v21 }
 0xc52   :  { %1481 = vst.msk [vmem:[%s1515_s5] sm:$0xff] %vm1480_vm7, %v1478_v52 }

</bundles_post_ra>
